<compile_context>
chip_gen: v7x
topology: tpu7x:2x2x1
jax: 0.10.0
libtpu: 0.0.40
codegen_flags: <defaults>
</compile_context>

<pallas_src>
import jax
import jax.numpy as jnp
from jax.experimental import pallas as pl
from jax.experimental.pallas import tpu as pltpu

_LANES = 128                     # vreg lane width
_SUBLANES = 8                    # f32 sublanes per vreg
_TILE_BYTES = 4 * 1024 * 1024    # 4 MiB per block (f32)
_VMEM_LIMIT_BYTES = 48 << 20     # above v5e's 16 MiB scoped default, < v7x 64 MiB


def _preprocess_kernel(mean_ref, std_ref, x_ref, o_ref):
    # mean_ref / std_ref: SMEM (3,) f32 scalar-prefetch arrays indexed by the
    # OUTPUT channel (the channel flip lives in the input index_map).
    # x_ref / o_ref: VMEM (1, 1, TILE_ROWS, LANE_DIM) tiles.
    c = pl.program_id(2)
    o_ref[...] = ((x_ref[...] - mean_ref[c]) * std_ref[c]).astype(o_ref.dtype)


def _round_up(v, m):
    return ((v + m - 1) // m) * m


def preprocess(x, out_dtype=None):
    """x: [N, 3, H, W].  Returns (flip(x, channel) - mean) * (1/std), NCHW."""
    n, c, h, w = x.shape
    assert c == 3, "Preprocess expects 3 input channels"
    out_dtype = x.dtype if out_dtype is None else out_dtype

    # RGB-ordered constants applied AFTER the channel flip (== torch module).
    mean = jnp.array([0.485, 0.456, 0.406], dtype=jnp.float32)
    inv_std = jnp.array([1.0 / 0.229, 1.0 / 0.224, 1.0 / 0.225],
                        dtype=jnp.float32)

    p = h * w
    elem_bytes = 4  # tile sizing assumes f32 input

    if p % _LANES == 0:
        # Copy-free lane-dense path: contiguous reshape, no HBM round trip.
        rows = p // _LANES
        x_view = x.reshape(n, c, rows, _LANES)
        row_dim, lane_dim = rows, _LANES
    else:
        # Ragged path: block NCHW directly; W = full last dim (always legal).
        x_view = x
        row_dim, lane_dim = h, w

    max_tile_rows = max(
        _SUBLANES,
        (_TILE_BYTES // (lane_dim * elem_bytes)) // _SUBLANES * _SUBLANES,
    )
    if row_dim <= max_tile_rows:
        tile_rows = row_dim            # full dim -> always a legal block dim
    else:
        tile_rows = max_tile_rows      # multiple of 8; edge block may be partial

    num_tiles = pl.cdiv(row_dim, tile_rows)

    # v7x megacore: guarantee the leading parallel axis has extent >= 2 when
    # the batch is 1 and the frame would otherwise fit a single row tile.
    if n == 1 and num_tiles == 1 and row_dim >= 2 * _SUBLANES:
        tile_rows = _round_up(pl.cdiv(row_dim, 2), _SUBLANES)
        num_tiles = pl.cdiv(row_dim, tile_rows)

    grid = (num_tiles, n, c)
    block = (1, 1, tile_rows, lane_dim)

    # Output channel j reads input channel 2 - j  (== torch .flip([1])).
    in_spec = pl.BlockSpec(
        block, lambda t, i, j, mean_ref, std_ref: (i, 2 - j, t, 0))
    out_spec = pl.BlockSpec(
        block, lambda t, i, j, mean_ref, std_ref: (i, j, t, 0))

    out = pl.pallas_call(
        _preprocess_kernel,
        out_shape=jax.ShapeDtypeStruct(x_view.shape, out_dtype),
        grid_spec=pltpu.PrefetchScalarGridSpec(
            num_scalar_prefetch=2,
            grid=grid,
            in_specs=[in_spec],
            out_specs=out_spec,
        ),
        compiler_params=pltpu.CompilerParams(
            dimension_semantics=("parallel", "parallel", "parallel"),
            vmem_limit_bytes=_VMEM_LIMIT_BYTES,
        ),
    )(mean, inv_std, x_view)

    return out.reshape(n, c, h, w)


if __name__ == "__main__":
    def ref_fn(x):
        m = jnp.array([0.485, 0.456, 0.406], dtype=jnp.float32).reshape(1, 3, 1, 1)
        s = jnp.array([1.0 / 0.229, 1.0 / 0.224, 1.0 / 0.225],
                      dtype=jnp.float32).reshape(1, 3, 1, 1)
        return (jnp.flip(x, axis=1) - m) * s

    key = jax.random.PRNGKey(0)

    # 1) Primary small test: aligned lane-dense path (H*W % 128 == 0).
    x1 = jax.random.uniform(key, (2, 3, 16, 16), dtype=jnp.float32)
    o1 = jax.block_until_ready(preprocess(x1))
    assert o1.shape == x1.shape
    assert jnp.allclose(o1, ref_fn(x1), atol=1e-6, rtol=1e-6)

    # 2) Ragged H*W: direct NCHW blocking (no pad/slice), partial edge tile,
    #    row-tile axis forced to extent 2 for megacore (N == 1).
    x2 = jax.random.uniform(jax.random.PRNGKey(1), (1, 3, 20, 23),
                            dtype=jnp.float32)
    o2 = jax.block_until_ready(preprocess(x2))
    assert o2.shape == x2.shape
    assert jnp.allclose(o2, ref_fn(x2), atol=1e-6, rtol=1e-6)

    # 3) Aligned path with N == 1: exercises the megacore split + a partial
    #    row tile on the lane-dense layout (rows = 20 -> tiles of 16).
    x3 = jax.random.uniform(jax.random.PRNGKey(2), (1, 3, 40, 64),
                            dtype=jnp.float32)
    o3 = jax.block_until_ready(preprocess(x3))
    assert o3.shape == x3.shape
    assert jnp.allclose(o3, ref_fn(x3), atol=1e-6, rtol=1e-6)

    # 4) Optional bf16 output (halves store traffic); loose tolerance.
    o4 = jax.block_until_ready(preprocess(x1, out_dtype=jnp.bfloat16))
    assert o4.dtype == jnp.bfloat16
    assert jnp.allclose(o4.astype(jnp.float32), ref_fn(x1), atol=3e-2, rtol=3e-2)

    print("KERNEL_OK")
</pallas_src>

<mosaic_0001>
module attributes {stable_mosaic.version = 11 : i64} {
  func.func @_preprocess_kernel(%arg0: i32, %arg1: i32, %arg2: i32, %arg3: memref<3xf32, #tpu.memory_space<smem>>, %arg4: memref<3xf32, #tpu.memory_space<smem>>, %arg5: memref<1x1x2x128xf32, #tpu.memory_space<vmem>>, %arg6: memref<1x1x2x128xf32, #tpu.memory_space<vmem>>) attributes {dimension_semantics = [#tpu.dimension_semantics<parallel>, #tpu.dimension_semantics<parallel>, #tpu.dimension_semantics<parallel>], iteration_bounds = array<i64: 1, 2, 3>, scalar_prefetch = 2 : i64, scratch_operands = 0 : i64, tpu.core_type = #tpu.core_type<tc>, window_params = [{transform_indices = @transform_0, window_bounds = array<i64: 1, 1, 2, 128>}, {transform_indices = @transform_1, window_bounds = array<i64: 1, 1, 2, 128>}]} {
    %c0 = arith.constant 0 : index
    %c0_0 = arith.constant 0 : index
    %c0_1 = arith.constant 0 : index
    %c0_2 = arith.constant 0 : index
    %0 = vector.load %arg5[%c0, %c0_0, %c0_1, %c0_2] : memref<1x1x2x128xf32, #tpu.memory_space<vmem>>, vector<1x1x2x128xf32>
    %1 = arith.index_cast %arg2 : i32 to index
    %2 = memref.load %arg3[%1] : memref<3xf32, #tpu.memory_space<smem>>
    %3 = vector.broadcast %2 : f32 to vector<1x1x2x128xf32>
    %4 = arith.subf %0, %3 : vector<1x1x2x128xf32>
    %5 = arith.index_cast %arg2 : i32 to index
    %6 = memref.load %arg4[%5] : memref<3xf32, #tpu.memory_space<smem>>
    %7 = vector.broadcast %6 : f32 to vector<1x1x2x128xf32>
    %8 = arith.mulf %4, %7 : vector<1x1x2x128xf32>
    %c0_3 = arith.constant 0 : index
    %c0_4 = arith.constant 0 : index
    %c0_5 = arith.constant 0 : index
    %c0_6 = arith.constant 0 : index
    %9 = vector.load %arg6[%c0_3, %c0_4, %c0_5, %c0_6] : memref<1x1x2x128xf32, #tpu.memory_space<vmem>>, vector<1x1x2x128xf32>
    tpu.vector_store %arg6[%c0_3, %c0_4, %c0_5, %c0_6], %8 {strides = array<i32>} : memref<1x1x2x128xf32, #tpu.memory_space<vmem>>, vector<1x1x2x128xf32>,
    return
  }
  func.func @transform_0(%arg0: i32, %arg1: i32, %arg2: i32, %arg3: memref<3xf32, #tpu.memory_space<smem>>, %arg4: memref<3xf32, #tpu.memory_space<smem>>) -> (i32, i32, i32, i32) {
    %c2_i32 = arith.constant 2 : i32
    %0 = arith.subi %c2_i32, %arg2 : i32
    %c0_i32 = arith.constant 0 : i32
    %c0_i32_0 = arith.constant 0 : i32
    return %arg1, %0, %arg0, %c0_i32 : i32, i32, i32, i32
  }
  func.func @transform_1(%arg0: i32, %arg1: i32, %arg2: i32, %arg3: memref<3xf32, #tpu.memory_space<smem>>, %arg4: memref<3xf32, #tpu.memory_space<smem>>) -> (i32, i32, i32, i32) {
    %c0_i32 = arith.constant 0 : i32
    %c0_i32_0 = arith.constant 0 : i32
    return %arg1, %arg2, %arg0, %c0_i32 : i32, i32, i32, i32
  }
}

</mosaic_0001>

<bundles_post_ra>
// kernel: tpu_custom_call.1
= control target key start
LH: loop header
LB: loop body
LE: loop exit
PB: predicated region body
PF: predicated region fallthrough
CT: control target
= control target key end

     0   :  { %s860_s0 = inlined_call_operand.hbm [shape: f32[3], index: 0, kind: input, shape index: {}]   ;;  %s861_s2 = inlined_call_operand.hbm [shape: f32[2,3,2,128], index: 2, kind: input, shape index: {}]   ;;  %s862_s3 = inlined_call_operand.hbm [shape: f32[2,3,2,128], index: 3, kind: output, shape index: {}]   ;;  %s863_s1 = inlined_call_operand.vmem [shape: f32[3], index: 1, kind: input, shape index: {}]  }
   0x1   :  { %s410_s14 = scalar_lea.hbm %s860_s0, 16 }
   0x2   :  { %p411_p0 = scmp.ne.s32.totalorder %s860_s0, %s410_s14  ;;  %p414_p1 = scmp.lt.u32.totalorder %s410_s14, %s860_s0 }
   0x4   :  { %p416_p2 = pnand %p414_p1, %p411_p0 }
   0x6   :  { %419 = shalt.err (!%p416_p2)  }
   0x7   :  { %s588_s19 = smov [#allocation3]   ;;  %s10_s24 = sshll.u32 %s863_s1, 4  ;;  %s11_s24 = int_to_ptr.vmem [resolvable:$true] %s10_s24 }
   0x8   :  { %9 = dma.hbm_to_smem %s860_s0, 16, %s588_s19, [#allocation2] }
   0x9   :  { %s420_s25 = scalar_lea.vmem %s11_s24, 16  ;;  %p425_p4 = scmp.lt.s32.totalorder %s11_s24, %s11_s24 }
   0xa   :  { %p421_p3 = scmp.ne.s32.totalorder %s11_s24, %s420_s25  ;;  %p426_p5 = scmp.lt.s32.totalorder %s420_s25, %s420_s25 }
   0xc   :  { %p427_p6 = por %p426_p5, %p425_p4 }
   0xe   :  { %p428_p7 = pnand %p427_p6, %p421_p3 }
  0x10   :  { %431 = shalt.err (!%p428_p7)  }
  0x11   :  { %s589_s26 = smov [#allocation4]  }
  0x12   :  { %13 = dma.vmem_to_smem %s11_s24, 16, %s589_s26, [#allocation2] }
  0x13   :  { %534 = dma.done.wait [#allocation2], 32 }
  0x14   :  { %535 = vsyncadd [#allocation2], 4294967264 }
  0x15   :  { %15 = sfence }
  0x16   :  { %16 = vsyncpa [#allocation6], 0 }
  0x17   :  { %18 = vsyncpa [#allocation6 + $0x1], 0 }
  0x18   :  { %19 = vsyncpa [#allocation7], 0 }
  0x19   :  { %21 = vsyncpa [#allocation7 + $0x1], 0  ;;  %s627_s0 = smov 0   ;;  %s629_s1 = smov 0  }
  0x1a   :  { %s631_s27 = smov 0   ;;  %s633_s28 = smov 0  }
  0x1b   :  { %s635_s29 = smov 0   ;;  %s637_s30 = smov 0  }
  0x1c   :  { %s639_s4 = smov 0   ;;  %s641_s5 = smov 0  }
  0x1d   :  { %s643_s6 = smov 0   ;;  %s645_s7 = smov 0  }
  0x1e   :  { %s647_s8 = smov 0  }
  0x1f LB: > { %s291_s9 = sadd.s32 4294967295, %s586_s8   ;;  %s292_s10 = sadd.s32 4294967294, %s586_s8   ;;  %s586_s8 = sphi %s647_s8, %s27_s8   ;;  %s582_s7 = sphi %s645_s7, %s885_s7   ;;  %s578_s6 = sphi %s643_s6, %s884_s6   ;;  %s574_s5 = sphi %s641_s5, %s883_s5   ;;  %s570_s4 = sphi %s639_s4, %s882_s4   ;;  %s566_s30 = sphi %s637_s30, %s881_s30   ;;  %s562_s29 = sphi %s635_s29, %s880_s29   ;;  %s558_s28 = sphi %s633_s28, %s879_s28   ;;  %s554_s27 = sphi %s631_s27, %s878_s27   ;;  %s550_s1 = sphi %s629_s1, %s877_s1   ;;  %s546_s0 = sphi %s627_s0, %s876_s0  }
  0x20   : > { %s39_s11 = sadd.s32 1, %s578_s6  ;;  %s42_s12 = sadd.s32 1, %s582_s7 }
  0x21   : > { %p40_p8 = scmp.ge.s32.totalorder %s39_s11, 3  ;;  %s50_s13 = ssub.s32 2, %s578_s6 }
  0x22   : > { %s59_s14 = sadd.s32 1, %s566_s30  ;;  %p66_p9 = scmp.ne.s32.totalorder %s566_s30, %s562_s29 }
  0x23   : > { %s887_s11 = smov (%p40_p8, %s39_s11), 0  ;;  %s889_s12 = smov (!%p40_p8, %s42_s12), %s582_s7 }
  0x24   : > { %s51_s15 = ssub.s32 2, %s887_s11  ;;  %p67_p10 = scmp.eq.s32.totalorder %s586_s8, 0 }
  0x25   : > { %p44_p11 = scmp.ge.s32.totalorder %s889_s12, 2  ;;  %s53_s16 = ssub.s32 %s50_s13, %s51_s15 }
  0x26   : > { %p697_p12 = por %p67_p10, %p66_p9  ;;  %p72_p13 = scmp.ne.s32.totalorder %s562_s29, %s558_s28 }
  0x27   : > { %s891_s12 = smov (%p44_p11, %s889_s12), 0  ;;  %p73_p0 = scmp.eq.s32.totalorder %s291_s9, 0 }
  0x28   : > { %867 = sst [smem:[#allocation12_spill]] %s891_s12  ;;  %s83_s18 = ssub.s32 %s578_s6, %s887_s11 }
  0x29   : > { %s52_s19 = ssub.s32 %s582_s7, %s891_s12  ;;  %s89_s20 = sadd.s32 1, %s554_s27 }
  0x2a   : > { %s54_s21 = sor.u32 %s53_s16, %s52_s19  ;;  %p712_p1 = por %p73_p0, %p72_p13 }
  0x2b   : > { %p57_p2 = scmp.eq.s32.totalorder %s54_s21, 0  ;;  %s84_s23 = sor.u32 %s83_s18, %s52_s19 }
  0x2c   : > { %p87_p3 = scmp.eq.s32.totalorder %s84_s23, 0  ;;  %p99_p4 = scmp.ne.s32.totalorder %s554_s27, %s550_s1 }
  0x2d   : > { %s719_s24 = scalar_select %p57_p2, %s566_s30, %s59_s14  }
  0x2e   : > { %s722_s25 = scalar_select %p87_p3, %s554_s27, %s89_s20  }
  0x2f   : > { %p100_p5 = scmp.eq.s32.totalorder %s291_s9, 5  ;;  %p105_p6 = scmp.ne.s32.totalorder %s550_s1, %s546_s0 }
  0x30   : > { %p106_p7 = scmp.eq.s32.totalorder %s292_s10, 5  ;;  %p318_p9 = scmp.lt.s32.totalorder %s586_s8, 6 }
  0x31   : > { %p730_p8 = por %p100_p5, %p99_p4  ;;  %s126_s15 = sand.u32 1, %s566_s30  }
  0x32   : > { %p735_p10 = por %p106_p7, %p105_p6  ;;  %s295_s14 = sshll.u32 %s126_s15, 1 }
  0x33   : > { %s869_s26 = scalar_select %p730_p8, 1, 0 }
  0x34   : > { %s870_s28 = scalar_select %p735_p10, 1, 0 }
  0x35   : > { %s304_s16 = smul.u32 3, %s582_s7  ;;  %s130_s18 = scalar_lea.vmem [#allocation5], %s295_s14 }
  0x36   : > { %s141_s19 = sshll.u32 %s130_s18, 4  ;;  %p743_p11 = pnand %p318_p9, %p697_p12  ;;  %s749_s19 = int_to_ptr.vmem [resolvable:$true] %s141_s19 }
  0x37   : > { %s137_s10 = sadd.s32 %s304_s16, %s50_s13  ;;  %s127_s17 = scalar_lea.sflag [#allocation6], %s126_s15 }
  0x38   : > { %s296_s20 = sshll.u32 %s137_s10, 5  ;;  %p434_p0 = pneg %p743_p11 }
  0x39   : > { %s754_s12 = scalar_lea.hbm %s861_s2, %s296_s20  ;;  %s437_s18 = scalar_lea.hbm %s861_s2, 192 }
  0x3a   : > { %s432_s14 = scalar_lea.hbm %s754_s12, 32  ;;  %p438_p4 = scmp.lt.u32.totalorder %s754_s12, %s861_s2 }
  0x3b   : > { %p433_p13 = scmp.ne.s32.totalorder %s754_s12, %s432_s14  ;;  %p439_p5 = scmp.lt.u32.totalorder %s437_s18, %s432_s14 }
  0x3c   : > { %p441_p7 = scmp.lt.u32.totalorder %s432_s14, %s754_s12 }
  0x3d   : > { %p435_p2 = pnand %p434_p0, %p433_p13  ;;  %p440_p6 = por %p439_p5, %p438_p4 }
  0x3f   : > { %p436_p3 = pneg %p435_p2  ;;  %p442_p9 = por %p441_p7, %p440_p6 }
  0x41   : > { %p443_p12 = pnand %p442_p9, %p436_p3 }
  0x43   : > { %446 = shalt.err (!%p443_p12)
}
  0x44   : > { %s447_s15 = scalar_lea.vmem %s749_s19, 32  ;;  %s590_s21 = smov [#allocation5]  }
  0x45   : > { %p448_p13 = scmp.ne.s32.totalorder %s749_s19, %s447_s15  ;;  %s452_s23 = sshll.u32 %s590_s21, 4  ;;  %s453_s23 = int_to_ptr.vmem [resolvable:$false] %s452_s23 }
  0x46   : > { %s454_s13 = scalar_lea.vmem %s453_s23, 64  ;;  %p455_p8 = scmp.lt.s32.totalorder %s749_s19, %s453_s23 }
  0x47   : > { %p450_p2 = pnand %p448_p13, %p434_p0  ;;  %p456_p4 = scmp.lt.s32.totalorder %s454_s13, %s447_s15 }
  0x49   : > { %p451_p10 = pneg %p450_p2  ;;  %p457_p5 = por %p456_p4, %p455_p8 }
  0x4b   : > { %p458_p6 = pnand %p457_p5, %p451_p10 }
  0x4d   : > { %461 = shalt.err (!%p458_p6)
}
  0x4e   : > { %313 = dma.hbm_to_vmem [thread:$0]  (!%p743_p11), %s754_s12, 32, %s749_s19, %s127_s17  }
  0x4f   : > { %p146_p12 = scmp.lt.s32.totalorder %s586_s8, 7  ;;  %p872_p3 = scmp.ge.s32.totalorder %s586_s8, 1 }
  0x51   : > { %p147_p0 = pnand %p872_p3, %p146_p12 }
  0x52   : > { %s152_s14 = sand.u32 (!%p147_p0), 1, %s562_s29  }
  0x53   : > { %150 = sbr.rel (%p147_p0) target bundleno = 120 (0x78), region = 24  ;;  %s298_s16 = sshll.u32 (!%p147_p0), %s152_s14, 1 }
  0x54   : > { %s153_s18 = scalar_lea.sflag (!%p147_p0), [#allocation6], %s152_s14  ;;  %s156_s10 = scalar_lea.vmem (!%p147_p0), [#allocation5], %s298_s16 }
  0x5a   : > { %537 = dma.done.wait (%p712_p1), %s153_s18, 32  }
  0x5b   : > { %539 = vsyncadd (%p712_p1), %s153_s18, 4294967264  ;;  %s172_s12 = sand.u32 1, %s550_s1   ;;  %s305_s19 = smul.u32 3, %s574_s5  ;;  %v176_v0 = vld [vmem:[%s156_s10] sm:$0x3] }
  0x5c   : > { %s177_s9 = sld [smem:[#allocation3 + %s570_s4]]  ;;  %s299_s20 = sshll.u32 %s172_s12, 1 }
  0x5d   : > { %s180_s17 = sld [smem:[#allocation4 + %s570_s4]]  ;;  %s197_s15 = sadd.s32 %s570_s4, %s305_s19 }
  0x5e   : > { %s174_s21 = scalar_lea.vmem [#allocation8], %s299_s20  ;;  %s301_s13 = sshll.u32 %s197_s15, 5 }
  0x5f   : > { %s201_s23 = sshll.u32 %s174_s21, 4  ;;  %s800_s5 = scalar_lea.hbm %s862_s3, %s301_s13  ;;  %s795_s23 = int_to_ptr.vmem [resolvable:$true] %s201_s23 }
  0x60   : > { %s185_s4 = scalar_lea.sflag [#allocation7], %s172_s12  ;;  %s462_s16 = scalar_lea.vmem %s795_s23, 32 }
  0x61   : > { %p463_p1 = scmp.ne.s32.totalorder %s795_s23, %s462_s16  ;;  %p873_p8 = scmp.ne.s32.totalorder %s869_s26, 0 }
  0x62   : > { %v178_v1 = vstv %s177_s9  ;;  %s591_s18 = smov [#allocation8]  }
  0x63   : > { %v181_v2 = vstv %s180_s17  ;;  %v179_v3 = vsub.f32 %v176_v0, %v178_v1  ;;  %p464_p10 = pnand %p463_p1, %p873_p8  ;;  %s466_s10 = sshll.u32 %s591_s18, 4  ;;  %s467_s10 = int_to_ptr.vmem [resolvable:$false] %s466_s10 }
  0x64   : > { %s468_s19 = scalar_lea.vmem %s467_s10, 64  ;;  %p469_p7 = scmp.lt.s32.totalorder %s795_s23, %s467_s10 }
  0x65   : > { %v182_v4 = vmul.f32 %v181_v2, %v179_v3  ;;  %p465_p11 = pneg %p464_p10  ;;  %p470_p9 = scmp.lt.s32.totalorder %s468_s19, %s462_s16 }
  0x67   : > { %183 = vst [vmem:[%s174_s21] sm:$0x3] %v182_v4  ;;  %p471_p13 = por %p470_p9, %p469_p7 }
  0x69   : > { %p472_p2 = pnand %p471_p13, %p465_p11 }
  0x6b   : > { %475 = shalt.err (!%p472_p2)
}
  0x6c   : > { %s476_s12 = scalar_lea.hbm %s800_s5, 32  ;;  %s480_s20 = scalar_lea.hbm %s862_s3, 192 }
  0x6d   : > { %p477_p4 = scmp.ne.s32.totalorder %s800_s5, %s476_s12  ;;  %p481_p12 = scmp.lt.u32.totalorder %s800_s5, %s862_s3 }
  0x6e   : > { %p482_p3 = scmp.lt.u32.totalorder %s480_s20, %s476_s12  ;;  %p484_p1 = scmp.lt.u32.totalorder %s476_s12, %s800_s5 }
  0x6f   : > { %p478_p5 = pnand %p477_p4, %p873_p8 }
  0x70   : > { %p483_p0 = por %p482_p3, %p481_p12 }
  0x71   : > { %p479_p6 = pneg %p478_p5 }
  0x72   : > { %p485_p10 = por %p484_p1, %p483_p0 }
  0x74   : > { %p486_p11 = pnand %p485_p10, %p479_p6 }
  0x76   : > { %489 = shalt.err (!%p486_p11)
}
  0x77   : > { %308 = dma.vmem_to_hbm [thread:$0]  (%p873_p8), %s795_s23, 32, %s800_s5, %s185_s4  }
  0x78 PF: > { %p319_p7 = scmp.ge.s32.totalorder %s586_s8, 2  ;;  %s213_s13 = sand.u32 1, %s546_s0  }
  0x79   : > { %p874_p9 = scmp.ne.s32.totalorder %s870_s28, 0  ;;  %s214_s22 = scalar_lea.sflag [#allocation7], %s213_s13 }
  0x7b   : > { %p315_p13 = pnand %p319_p7, %p874_p9 }
  0x7d   : > { %541 = dma.done.wait (!%p315_p13), %s214_s22, 32  }
  0x7e   : > { %543 = vsyncadd (!%p315_p13), %s214_s22, 4294967264  ;;  %s27_s8 = sadd.s32 1, %s586_s8   ;;  %s875_s26 = sld [smem:[#allocation12_spill]] }
  0x7f   : > { %p24_p2 = scmp.ge.s32.totalorder %s27_s8, 8   ;;  %s876_s0 = smov %s550_s1 }
  0x80   : > { %s877_s1 = smov %s554_s27  ;;  %s878_s27 = smov %s722_s25 }
  0x81   : > { %s879_s28 = smov %s562_s29  ;;  %s880_s29 = smov %s566_s30 }
  0x82   : > { %s881_s30 = smov %s719_s24  ;;  %s882_s4 = smov %s578_s6 }
  0x83   : > { %s883_s5 = smov %s582_s7  ;;  %s884_s6 = smov %s887_s11 }
  0x84   : > { %s885_s7 = smov %s875_s26  ;;  %26 = sbr.rel (!%p24_p2) target bundleno = 31 (0x1f), region = 69 }
  0x8b   :  { %219 = vsyncpa [#allocation6], 1 }
  0x8c   :  { %221 = vsyncpa [#allocation6 + $0x1], 1 }
  0x8d   :  { %222 = vsyncpa [#allocation7], 1 }
  0x8e   :  { %224 = vsyncpa [#allocation7 + $0x1], 1 }

</bundles_post_ra>
